<compile_context>
chip_gen: v7x
topology: tpu7x:2x2x1
jax: 0.10.0
libtpu: 0.0.40
codegen_flags: <defaults>
</compile_context>

<pallas_src>
import functools

import numpy as np
import jax
import jax.numpy as jnp
from jax.experimental import pallas as pl
from jax.experimental.pallas import tpu as pltpu


# ---------------------------------------------------------------------------
# Fused kernel.
#   grid=(P,) over planes:
#     every step : area_acc[b] += sel[p,b] * sum_f max(-(view_b . n_f*a_f), 0)
#     last step  : Gram-identity pairwise MSE + angle/freq contrastive combine
#                  + masked mean  ->  o_ref[1,1]
# ---------------------------------------------------------------------------
def _contrastive_loss_kernel(views_ref, normals_ref, sel_ref, x_ref, freqs_ref,
                             mask_ref, o_ref, area_acc,
                             *, margin, beta, inv_n, inv_pairs):
    p = pl.program_id(0)

    @pl.when(p == 0)
    def _init():
        area_acc[...] = jnp.zeros_like(area_acc)

    # Projected area of every sample's view against this plane's mesh.
    # normals_ref holds area-scaled normals, so the per-face contribution is
    # simply max(-dot, 0) (back-facing test + |dot|*area in one op).
    v = views_ref[...]                                              # [B, 3]
    nt = normals_ref[0]                                             # [3, F_pad]
    dots = jnp.dot(v, nt, preferred_element_type=jnp.float32)       # [B, F_pad]
    contrib = jnp.sum(jnp.maximum(-dots, 0.0), axis=1, keepdims=True)   # [B, 1]
    # Only samples belonging to this plane pick up the contribution.
    area_acc[...] += sel_ref[p] * contrib

    @pl.when(p == pl.num_programs(0) - 1)
    def _finalize():
        x = x_ref[...]                                              # [B, N] f32
        # Gram matrix on the MXU: g[i,j] = <x_i, x_j> (contract last dims).
        g = jax.lax.dot_general(x, x, (((1,), (1,)), ((), ())),
                                preferred_element_type=jnp.float32)  # [B, B]
        b = g.shape[0]
        ii = jax.lax.broadcasted_iota(jnp.int32, (b, b), 0)
        jj = jax.lax.broadcasted_iota(jnp.int32, (b, b), 1)
        on_diag = ii == jj

        # ||x_i||^2 as column / row, read off the Gram diagonal (no transpose op).
        sq_diag = jnp.where(on_diag, g, 0.0)
        sq_col = jnp.sum(sq_diag, axis=1, keepdims=True)            # [B, 1]
        sq_row = jnp.sum(sq_diag, axis=0, keepdims=True)            # [1, B]
        # mse[i,j] = mean((x_i - x_j)^2); clamp cancellation negatives.
        mse = jnp.maximum((sq_col + sq_row - 2.0 * g) * inv_n, 0.0)

        # [B,1] column -> [1,B] row without reshape/transpose: put the column on
        # the diagonal and reduce over sublanes (XLU), same trick as sq_row.
        def row_of(col):
            return jnp.sum(jnp.where(on_diag, col, 0.0), axis=0, keepdims=True)

        area_col = area_acc[...]                                    # [B, 1]
        area_diff = jnp.abs(area_col - row_of(area_col))            # [B, B]
        # Reference: sim = 1/(1+10*diff), clipped to [0,1] (clip is a no-op here).
        angle_sim = pl.reciprocal(1.0 + 10.0 * area_diff, approx=True)
        angle_dif = 1.0 - angle_sim

        freq_col = freqs_ref[...]                                   # [B, 1]
        freq_dif = jnp.abs(freq_col - row_of(freq_col))             # [B, B]
        freq_sim = 1.0 - freq_dif

        hinge = jnp.maximum(mse - margin, 0.0)
        angle_loss = mse * angle_sim - hinge * angle_dif
        freq_loss = mse * freq_sim - hinge * freq_dif
        pair = angle_loss + beta * freq_loss
        # Masked sum over same-plane upper-triangle pairs, divided by pair count.
        o_ref[...] = jnp.sum(pair * mask_ref[...], keepdims=True) * inv_pairs


def _fused_contrastive_call(views, normals_scaled, sel, x, freqs_col, mask,
                            *, margin, beta, pair_count):
    p_count, _, f_pad = normals_scaled.shape
    b, n = x.shape
    kernel = functools.partial(
        _contrastive_loss_kernel,
        margin=float(margin), beta=float(beta),
        inv_n=1.0 / float(n), inv_pairs=1.0 / float(pair_count))
    out = pl.pallas_call(
        kernel,
        out_shape=jax.ShapeDtypeStruct((1, 1), jnp.float32),
        grid=(p_count,),
        in_specs=[
            pl.BlockSpec((b, 3), lambda p: (0, 0)),                 # views (resident)
            pl.BlockSpec((1, 3, f_pad), lambda p: (p, 0, 0)),       # per-plane normals*area
            pl.BlockSpec((p_count, b, 1), lambda p: (0, 0, 0)),     # sel (resident)
            pl.BlockSpec((b, n), lambda p: (0, 0)),                 # x (resident)
            pl.BlockSpec((b, 1), lambda p: (0, 0)),                 # freqs (resident)
            pl.BlockSpec((b, b), lambda p: (0, 0)),                 # pair mask (resident)
        ],
        out_specs=pl.BlockSpec((1, 1), lambda p: (0, 0)),
        scratch_shapes=[pltpu.VMEM((b, 1), jnp.float32)],           # per-sample area acc
        compiler_params=pltpu.CompilerParams(
            dimension_semantics=("arbitrary",)),
    )(views, normals_scaled, sel, x, freqs_col, mask)
    return out[0, 0]


# ---------------------------------------------------------------------------
# Host glue: stack per-plane meshes with face areas folded into the normals
# (F padded to a multiple of 128, lane-dense) and build selection / pair masks.
# ---------------------------------------------------------------------------
def _stack_plane_meshes(plane_names, normals_by_plane, areas_by_plane):
    names = sorted(set(plane_names))
    b = len(plane_names)
    p_count = len(names)
    f_max = max(int(np.asarray(normals_by_plane[nm]).shape[0]) for nm in names)
    f_pad = max(128, ((f_max + 127) // 128) * 128)
    normals_scaled = np.zeros((p_count, 3, f_pad), np.float32)
    sel = np.zeros((p_count, b, 1), np.float32)
    for p, name in enumerate(names):
        nrm = np.asarray(normals_by_plane[name], np.float32)        # [F, 3]
        ar = np.asarray(areas_by_plane[name], np.float32).reshape(-1, 1)  # [F, 1]
        f = nrm.shape[0]
        normals_scaled[p, :, :f] = (nrm * ar).T                     # fold area into normals
        for k in range(b):
            if plane_names[k] == name:
                sel[p, k, 0] = 1.0
    return jnp.asarray(normals_scaled), jnp.asarray(sel)


# ---------------------------------------------------------------------------
# Synthetic mesh (deterministic) — replaces trimesh .obj loading.
# ---------------------------------------------------------------------------
def make_synthetic_mesh(key, num_faces=512):
    # TODO(synk): trimesh .obj loading has no Pallas/JAX equivalent; face normals
    # and areas are synthesized deterministically instead.
    k1, k2 = jax.random.split(key)
    n = jax.random.normal(k1, (num_faces, 3), jnp.float32)
    n = n / jnp.linalg.norm(n, axis=1, keepdims=True)
    a = jax.random.uniform(k2, (num_faces,), jnp.float32, minval=0.01, maxval=0.05)
    return n, a


# ---------------------------------------------------------------------------
# forward() equivalent
# ---------------------------------------------------------------------------
def contrastive_loss(rcs, plane_names, theta_deg, phi_deg, freqs,
                     mesh_normals_by_plane, mesh_areas_by_plane,
                     margin=0.1, beta=0.1):
    b = rcs.shape[0]

    # Pair mask: upper triangle, same plane name (string compare -> host glue).
    mask_np = np.zeros((b, b), dtype=np.float32)
    for i in range(b):
        for j in range(i + 1, b):
            if plane_names[i] == plane_names[j]:
                mask_np[i, j] = 1.0
    pair_count = int(mask_np.sum())
    if pair_count == 0:
        return jnp.float32(0.0)

    x = rcs.reshape(b, -1).astype(jnp.float32)                      # [B, N]

    # View vectors (spherical -> cartesian), [B, 3].
    theta = jnp.deg2rad(theta_deg.astype(jnp.float32))
    phi = jnp.deg2rad(phi_deg.astype(jnp.float32))
    views = jnp.stack([jnp.sin(phi) * jnp.cos(theta),
                       jnp.sin(phi) * jnp.sin(theta),
                       jnp.cos(phi)], axis=1)

    normals_scaled, sel = _stack_plane_meshes(plane_names, mesh_normals_by_plane,
                                              mesh_areas_by_plane)

    return _fused_contrastive_call(
        views, normals_scaled, sel, x,
        freqs.astype(jnp.float32).reshape(b, 1),
        jnp.asarray(mask_np),
        margin=margin, beta=beta, pair_count=pair_count)


if __name__ == "__main__":
    key = jax.random.PRNGKey(0)
    k_rcs, k_mesh = jax.random.split(key)

    # Inputs mirroring the reference in_em (4 samples).
    plane_names = ('b7fd', 'bb7c', 'b7fd', 'bb7c')
    theta_deg = jnp.array([30., 150., 150., 150.], jnp.float32)
    phi_deg = jnp.array([270., 60., 150., 330.], jnp.float32)
    freqs = jnp.array([0.9375, 0.8192, 0.8591, 0.9227], jnp.float32)

    b, h, w = 4, 16, 16
    rcs = jax.random.normal(k_rcs, (b, h, w), jnp.float32)

    mesh_normals, mesh_areas = {}, {}
    for idx, name in enumerate(sorted(set(plane_names))):
        n_, a_ = make_synthetic_mesh(jax.random.fold_in(k_mesh, idx), num_faces=512)
        mesh_normals[name], mesh_areas[name] = n_, a_

    loss = contrastive_loss(rcs, plane_names, theta_deg, phi_deg, freqs,
                            mesh_normals, mesh_areas, margin=0.1, beta=0.1)
    jax.block_until_ready(loss)
    print("KERNEL_OK")
</pallas_src>

<mosaic_0001>
module attributes {stable_mosaic.version = 11 : i64} {
  func.func @_contrastive_loss_kernel(%arg0: i32, %arg1: memref<4x3xf32, #tpu.memory_space<vmem>>, %arg2: memref<1x3x512xf32, #tpu.memory_space<vmem>>, %arg3: memref<2x4x1xf32, #tpu.memory_space<vmem>>, %arg4: memref<4x256xf32, #tpu.memory_space<vmem>>, %arg5: memref<4x1xf32, #tpu.memory_space<vmem>>, %arg6: memref<4x4xf32, #tpu.memory_space<vmem>>, %arg7: memref<1x1xf32, #tpu.memory_space<vmem>>, %arg8: memref<4x1xf32, #tpu.memory_space<vmem>>) attributes {dimension_semantics = [#tpu.dimension_semantics<arbitrary>], iteration_bounds = array<i64: 2>, scalar_prefetch = 0 : i64, scratch_operands = 1 : i64, tpu.core_type = #tpu.core_type<tc>, window_params = [{pipeline_mode = #tpu.pipeline_mode<synchronous>, transform_indices = @transform_0, window_bounds = array<i64: 4, 3>}, {transform_indices = @transform_1, window_bounds = array<i64: 1, 3, 512>}, {pipeline_mode = #tpu.pipeline_mode<synchronous>, transform_indices = @transform_2, window_bounds = array<i64: 2, 4, 1>}, {pipeline_mode = #tpu.pipeline_mode<synchronous>, transform_indices = @transform_3, window_bounds = array<i64: 4, 256>}, {pipeline_mode = #tpu.pipeline_mode<synchronous>, transform_indices = @transform_4, window_bounds = array<i64: 4, 1>}, {pipeline_mode = #tpu.pipeline_mode<synchronous>, transform_indices = @transform_5, window_bounds = array<i64: 4, 4>}, {pipeline_mode = #tpu.pipeline_mode<synchronous>, transform_indices = @transform_6, window_bounds = array<i64: 1, 1>}]} {
    %c0_i32 = arith.constant 0 : i32
    %0 = arith.cmpi eq, %arg0, %c0_i32 : i32
    %1 = arith.extui %0 : i1 to i32
    %c0_i32_0 = arith.constant 0 : i32
    %2 = arith.cmpi ne, %1, %c0_i32_0 : i32
    scf.if %2 {
      %cst_15 = arith.constant 0.000000e+00 : f32
      %23 = vector.broadcast %cst_15 : f32 to vector<4x1xf32>
      %c0_16 = arith.constant 0 : index
      %c0_17 = arith.constant 0 : index
      %24 = vector.load %arg8[%c0_16, %c0_17] : memref<4x1xf32, #tpu.memory_space<vmem>>, vector<4x1xf32>
      tpu.vector_store %arg8[%c0_16, %c0_17], %23 {strides = array<i32>} : memref<4x1xf32, #tpu.memory_space<vmem>>, vector<4x1xf32>,
    } else {
    }
    %c0 = arith.constant 0 : index
    %c0_1 = arith.constant 0 : index
    %3 = vector.load %arg1[%c0, %c0_1] : memref<4x3xf32, #tpu.memory_space<vmem>>, vector<4x3xf32>
    %c0_2 = arith.constant 0 : index
    %c0_3 = arith.constant 0 : index
    %c0_4 = arith.constant 0 : index
    %4 = vector.load %arg2[%c0_2, %c0_3, %c0_4] : memref<1x3x512xf32, #tpu.memory_space<vmem>>, vector<1x3x512xf32>
    %5 = vector.shape_cast %4 : vector<1x3x512xf32> to vector<3x512xf32>
    %cst = arith.constant dense<0.000000e+00> : vector<4x512xf32>
    %6 = tpu.matmul %3, %5, %cst {dimension_numbers = #tpu.dot_dimension_numbers<[1], [0], [0], [1], [0, 0, 1, 1], [], []>} : vector<4x3xf32>, vector<3x512xf32>, vector<4x512xf32> -> vector<4x512xf32>
    %cst_5 = arith.constant 0.000000e+00 : f32
    %7 = vector.broadcast %cst_5 : f32 to vector<4x512xf32>
    %8 = arith.subf %7, %6 : vector<4x512xf32>
    %cst_6 = arith.constant 0.000000e+00 : f32
    %9 = vector.broadcast %cst_6 : f32 to vector<4x512xf32>
    %10 = arith.maximumf %8, %9 : vector<4x512xf32>
    %cst_7 = arith.constant dense<0.000000e+00> : vector<4xf32>
    %11 = vector.multi_reduction <add>, %10, %cst_7 [1] : vector<4x512xf32> to vector<4xf32>
    %12 = vector.shape_cast %11 : vector<4xf32> to vector<4x1xf32>
    %c0_8 = arith.constant 0 : index
    %c0_9 = arith.constant 0 : index
    %13 = vector.load %arg8[%c0_8, %c0_9] : memref<4x1xf32, #tpu.memory_space<vmem>>, vector<4x1xf32>
    %14 = arith.index_cast %arg0 : i32 to index
    %c0_10 = arith.constant 0 : index
    %c0_11 = arith.constant 0 : index
    %15 = vector.load %arg3[%14, %c0_10, %c0_11] : memref<2x4x1xf32, #tpu.memory_space<vmem>>, vector<1x4x1xf32>
    %16 = vector.shape_cast %15 : vector<1x4x1xf32> to vector<4x1xf32>
    %17 = arith.mulf %16, %12 : vector<4x1xf32>
    %18 = arith.addf %13, %17 : vector<4x1xf32>
    %c0_12 = arith.constant 0 : index
    %c0_13 = arith.constant 0 : index
    %19 = vector.load %arg8[%c0_12, %c0_13] : memref<4x1xf32, #tpu.memory_space<vmem>>, vector<4x1xf32>
    tpu.vector_store %arg8[%c0_12, %c0_13], %18 {strides = array<i32>} : memref<4x1xf32, #tpu.memory_space<vmem>>, vector<4x1xf32>,
    %c1_i32 = arith.constant 1 : i32
    %20 = arith.cmpi eq, %arg0, %c1_i32 : i32
    %21 = arith.extui %20 : i1 to i32
    %c0_i32_14 = arith.constant 0 : i32
    %22 = arith.cmpi ne, %21, %c0_i32_14 : i32
    scf.if %22 {
      %c0_15 = arith.constant 0 : index
      %c0_16 = arith.constant 0 : index
      %23 = vector.load %arg4[%c0_15, %c0_16] : memref<4x256xf32, #tpu.memory_space<vmem>>, vector<4x256xf32>
      %cst_17 = arith.constant dense<0.000000e+00> : vector<4x4xf32>
      %24 = tpu.matmul %23, %23, %cst_17 {dimension_numbers = #tpu.dot_dimension_numbers<[1], [1], [0], [0], [0, 0, 1, 0], [], []>} : vector<4x256xf32>, vector<4x256xf32>, vector<4x4xf32> -> vector<4x4xf32>
      %25 = tpu.iota {dimensions = array<i32: 0>} : vector<4x4xi32>
      %26 = tpu.iota {dimensions = array<i32: 1>} : vector<4x4xi32>
      %27 = arith.cmpi eq, %25, %26 : vector<4x4xi32>
      %cst_18 = arith.constant 0.000000e+00 : f32
      %28 = vector.broadcast %cst_18 : f32 to vector<4x4xf32>
      %29 = arith.select %27, %24, %28 : vector<4x4xi1>, vector<4x4xf32>
      %cst_19 = arith.constant dense<0.000000e+00> : vector<4xf32>
      %30 = vector.multi_reduction <add>, %29, %cst_19 [1] : vector<4x4xf32> to vector<4xf32>
      %31 = vector.shape_cast %30 : vector<4xf32> to vector<4x1xf32>
      %cst_20 = arith.constant dense<0.000000e+00> : vector<4xf32>
      %32 = vector.multi_reduction <add>, %29, %cst_20 [0] : vector<4x4xf32> to vector<4xf32>
      %33 = vector.shape_cast %32 : vector<4xf32> to vector<1x4xf32>
      %34 = vector.broadcast %31 : vector<4x1xf32> to vector<4x4xf32>
      %35 = vector.broadcast %33 : vector<1x4xf32> to vector<4x4xf32>
      %36 = arith.addf %34, %35 : vector<4x4xf32>
      %cst_21 = arith.constant 2.000000e+00 : f32
      %37 = vector.broadcast %cst_21 : f32 to vector<4x4xf32>
      %38 = arith.mulf %37, %24 : vector<4x4xf32>
      %39 = arith.subf %36, %38 : vector<4x4xf32>
      %cst_22 = arith.constant 3.906250e-03 : f32
      %40 = vector.broadcast %cst_22 : f32 to vector<4x4xf32>
      %41 = arith.mulf %39, %40 : vector<4x4xf32>
      %cst_23 = arith.constant 0.000000e+00 : f32
      %42 = vector.broadcast %cst_23 : f32 to vector<4x4xf32>
      %43 = arith.maximumf %41, %42 : vector<4x4xf32>
      %c0_24 = arith.constant 0 : index
      %c0_25 = arith.constant 0 : index
      %44 = vector.load %arg8[%c0_24, %c0_25] : memref<4x1xf32, #tpu.memory_space<vmem>>, vector<4x1xf32>
      %cst_26 = arith.constant 0.000000e+00 : f32
      %45 = vector.shape_cast %44 : vector<4x1xf32> to vector<4x1xf32>
      %46 = vector.broadcast %45 : vector<4x1xf32> to vector<4x4xf32>
      %47 = vector.broadcast %cst_26 : f32 to vector<4x4xf32>
      %48 = arith.select %27, %46, %47 : vector<4x4xi1>, vector<4x4xf32>
      %cst_27 = arith.constant dense<0.000000e+00> : vector<4xf32>
      %49 = vector.multi_reduction <add>, %48, %cst_27 [0] : vector<4x4xf32> to vector<4xf32>
      %50 = vector.shape_cast %49 : vector<4xf32> to vector<1x4xf32>
      %51 = vector.broadcast %44 : vector<4x1xf32> to vector<4x4xf32>
      %52 = vector.broadcast %50 : vector<1x4xf32> to vector<4x4xf32>
      %53 = arith.subf %51, %52 : vector<4x4xf32>
      %54 = math.absf %53 : vector<4x4xf32>
      %cst_28 = arith.constant 1.000000e+01 : f32
      %55 = vector.broadcast %cst_28 : f32 to vector<4x4xf32>
      %56 = arith.mulf %55, %54 : vector<4x4xf32>
      %cst_29 = arith.constant 1.000000e+00 : f32
      %57 = vector.broadcast %cst_29 : f32 to vector<4x4xf32>
      %58 = arith.addf %57, %56 : vector<4x4xf32>
      %59 = tpu.reciprocal %58 {approx = true} : vector<4x4xf32> -> vector<4x4xf32>
      %cst_30 = arith.constant 1.000000e+00 : f32
      %60 = vector.broadcast %cst_30 : f32 to vector<4x4xf32>
      %61 = arith.subf %60, %59 : vector<4x4xf32>
      %c0_31 = arith.constant 0 : index
      %c0_32 = arith.constant 0 : index
      %62 = vector.load %arg5[%c0_31, %c0_32] : memref<4x1xf32, #tpu.memory_space<vmem>>, vector<4x1xf32>
      %cst_33 = arith.constant 0.000000e+00 : f32
      %63 = vector.shape_cast %62 : vector<4x1xf32> to vector<4x1xf32>
      %64 = vector.broadcast %63 : vector<4x1xf32> to vector<4x4xf32>
      %65 = vector.broadcast %cst_33 : f32 to vector<4x4xf32>
      %66 = arith.select %27, %64, %65 : vector<4x4xi1>, vector<4x4xf32>
      %cst_34 = arith.constant dense<0.000000e+00> : vector<4xf32>
      %67 = vector.multi_reduction <add>, %66, %cst_34 [0] : vector<4x4xf32> to vector<4xf32>
      %68 = vector.shape_cast %67 : vector<4xf32> to vector<1x4xf32>
      %69 = vector.broadcast %62 : vector<4x1xf32> to vector<4x4xf32>
      %70 = vector.broadcast %68 : vector<1x4xf32> to vector<4x4xf32>
      %71 = arith.subf %69, %70 : vector<4x4xf32>
      %72 = math.absf %71 : vector<4x4xf32>
      %cst_35 = arith.constant 1.000000e+00 : f32
      %73 = vector.broadcast %cst_35 : f32 to vector<4x4xf32>
      %74 = arith.subf %73, %72 : vector<4x4xf32>
      %cst_36 = arith.constant 1.000000e-01 : f32
      %75 = vector.broadcast %cst_36 : f32 to vector<4x4xf32>
      %76 = arith.subf %43, %75 : vector<4x4xf32>
      %cst_37 = arith.constant 0.000000e+00 : f32
      %77 = vector.broadcast %cst_37 : f32 to vector<4x4xf32>
      %78 = arith.maximumf %76, %77 : vector<4x4xf32>
      %79 = arith.mulf %43, %59 : vector<4x4xf32>
      %80 = arith.mulf %78, %61 : vector<4x4xf32>
      %81 = arith.subf %79, %80 : vector<4x4xf32>
      %82 = arith.mulf %43, %74 : vector<4x4xf32>
      %83 = arith.mulf %78, %72 : vector<4x4xf32>
      %84 = arith.subf %82, %83 : vector<4x4xf32>
      %cst_38 = arith.constant 1.000000e-01 : f32
      %85 = vector.broadcast %cst_38 : f32 to vector<4x4xf32>
      %86 = arith.mulf %85, %84 : vector<4x4xf32>
      %87 = arith.addf %81, %86 : vector<4x4xf32>
      %c0_39 = arith.constant 0 : index
      %c0_40 = arith.constant 0 : index
      %88 = vector.load %arg6[%c0_39, %c0_40] : memref<4x4xf32, #tpu.memory_space<vmem>>, vector<4x4xf32>
      %89 = arith.mulf %87, %88 : vector<4x4xf32>
      %90 = vector.shape_cast %89 : vector<4x4xf32> to vector<1x4x4xf32>
      %cst_41 = arith.constant dense<0.000000e+00> : vector<1xf32>
      %91 = vector.multi_reduction <add>, %90, %cst_41 [1, 2] : vector<1x4x4xf32> to vector<1xf32>
      %92 = vector.shape_cast %91 : vector<1xf32> to vector<1x1x1xf32>
      %93 = vector.extract %92[0, 0, 0] : f32 from vector<1x1x1xf32>
      %94 = vector.broadcast %93 : f32 to vector<1x1xf32>
      %cst_42 = arith.constant 5.000000e-01 : f32
      %95 = vector.broadcast %cst_42 : f32 to vector<1x1xf32>
      %96 = arith.mulf %94, %95 : vector<1x1xf32>
      %c0_43 = arith.constant 0 : index
      %c0_44 = arith.constant 0 : index
      %97 = vector.load %arg7[%c0_43, %c0_44] : memref<1x1xf32, #tpu.memory_space<vmem>>, vector<1x1xf32>
      tpu.vector_store %arg7[%c0_43, %c0_44], %96 {strides = array<i32>} : memref<1x1xf32, #tpu.memory_space<vmem>>, vector<1x1xf32>,
    } else {
    }
    return
  }
  func.func @transform_0(%arg0: i32) -> (i32, i32) {
    %c0_i32 = arith.constant 0 : i32
    %c0_i32_0 = arith.constant 0 : i32
    %c0_i32_1 = arith.constant 0 : i32
    return %c0_i32, %c0_i32_0 : i32, i32
  }
  func.func @transform_1(%arg0: i32) -> (i32, i32, i32) {
    %c0_i32 = arith.constant 0 : i32
    %c0_i32_0 = arith.constant 0 : i32
    %c0_i32_1 = arith.constant 0 : i32
    return %arg0, %c0_i32, %c0_i32_0 : i32, i32, i32
  }
  func.func @transform_2(%arg0: i32) -> (i32, i32, i32) {
    %c0_i32 = arith.constant 0 : i32
    %c0_i32_0 = arith.constant 0 : i32
    %c0_i32_1 = arith.constant 0 : i32
    %c0_i32_2 = arith.constant 0 : i32
    return %c0_i32, %c0_i32_0, %c0_i32_1 : i32, i32, i32
  }
  func.func @transform_3(%arg0: i32) -> (i32, i32) {
    %c0_i32 = arith.constant 0 : i32
    %c0_i32_0 = arith.constant 0 : i32
    %c0_i32_1 = arith.constant 0 : i32
    return %c0_i32, %c0_i32_0 : i32, i32
  }
  func.func @transform_4(%arg0: i32) -> (i32, i32) {
    %c0_i32 = arith.constant 0 : i32
    %c0_i32_0 = arith.constant 0 : i32
    %c0_i32_1 = arith.constant 0 : i32
    return %c0_i32, %c0_i32_0 : i32, i32
  }
  func.func @transform_5(%arg0: i32) -> (i32, i32) {
    %c0_i32 = arith.constant 0 : i32
    %c0_i32_0 = arith.constant 0 : i32
    %c0_i32_1 = arith.constant 0 : i32
    return %c0_i32, %c0_i32_0 : i32, i32
  }
  func.func @transform_6(%arg0: i32) -> (i32, i32) {
    %c0_i32 = arith.constant 0 : i32
    %c0_i32_0 = arith.constant 0 : i32
    %c0_i32_1 = arith.constant 0 : i32
    return %c0_i32, %c0_i32_0 : i32, i32
  }
}

</mosaic_0001>

<bundles_post_ra>
// kernel: tpu_custom_call.1
= control target key start
LH: loop header
LB: loop body
LE: loop exit
PB: predicated region body
PF: predicated region fallthrough
CT: control target
= control target key end

     0   :  { %11 = vsyncpa [#allocation4], 0  ;;  %s766_s21 = smov 0   ;;  %s829_s0 = inlined_call_operand.vmem [shape: f32[4,3], index: 0, kind: input, shape index: {}]   ;;  %s830_s1 = inlined_call_operand.vmem [shape: f32[2,3,512], index: 1, kind: input, shape index: {}]   ;;  %s831_s2 = inlined_call_operand.vmem [shape: f32[2,4,1], index: 2, kind: input, shape index: {}]   ;;  %s832_s3 = inlined_call_operand.vmem [shape: f32[4,256], index: 3, kind: input, shape index: {}]   ;;  %s833_s4 = inlined_call_operand.vmem [shape: f32[4,1], index: 4, kind: input, shape index: {}]   ;;  %s834_s5 = inlined_call_operand.vmem [shape: f32[4,4], index: 5, kind: input, shape index: {}]   ;;  %s835_s6 = inlined_call_operand.hbm [shape: f32[1,1], index: 6, kind: output, shape index: {}]  }
   0x1 LB: > { %s772_s22 = sadd.s32 4294967295, %s725_s21   ;;  %p645_p0 = scmp.ge.s32.totalorder %s725_s21, 1  ;;  %s725_s21 = sphi %s766_s21, %s17_s21  }
   0x2   : > { %p208_p1 = scmp.lt.s32.totalorder %s725_s21, 3 }
   0x4   : > { %p209_p2 = pnand %p645_p0, %p208_p1 }
   0x5   : > { %p233_p3 = scmp.lt.s32.totalorder (!%p209_p2), %s772_s22, 1  ;;  %p648_p4 = scmp.ne.s32.totalorder (!%p209_p2), %s772_s22, 0 }
   0x6   : > { %212 = sbr.rel (%p209_p2) target bundleno = 850 (0x352), region = 44 }
   0xd   : > { %s234_s23 = scalar_select %p233_p3, %s772_s22, 1 }
   0xe   : > { %241 = sbr.rel (%p648_p4) target bundleno = 21 (0x15), region = 48  ;;  %vm242_vm0 = vcmask (!%p648_p4), 3072   ;;  %v727_v0 = vmov (!%p648_p4), 0.0  }
   0xf   : > { %s662_s24 = sshll.u32 %s234_s23, 4  ;;  %243 = vst.msk [vmem:[#allocation2] sm:$0xf] (!%p648_p4), %vm242_vm0, %v727_v0 }
  0x10   : > { %s237_s27 = scalar_lea.vmem %s830_s1, %s662_s24 }
  0x15 PF: > { %v245_v1 = vld [vmem:[%s237_s27] sm:$0x77]  ;;  %vm255_vm1 = vcmask 1042432   ;;  %v728_v3 = vmov 0.0   ;;  %v246_v4 = vld [vmem:[%s237_s27 + $0x8] sm:$0x77] }
  0x16   : > { %v249_v2 = vcombine.high %v245_v1, %v245_v1  ;;  %328 = vmatprep.mubr.f32.mxu0 %v728_v3  ;;  %399 = vmatprep.mubr.f32.mxu1 %v728_v3  ;;  %v244_v5 = vld [vmem:[%s829_s0] sm:$0xf]  ;;  %vm251_vm2 = vcmask 23552   ;;  %v250_v6 = vcombine.high %v246_v4, %v246_v4  ;;  %vm414_vm3 = vcmask 1043456   ;;  %s655_s30 = sshll.u32 %s772_s22, 2  ;;  %p656_p5 = scmp.ne.s32.totalorder %s772_s22, 1 }
  0x17   : > { %s426_s9 = scalar_lea.vmem %s831_s2, %s655_s30  ;;  %v424_v28 = vld [vmem:[#allocation2] sm:$0xf]  ;;  %vm430_vm4 = vcmask 3072   ;;  %v729_v34 = vmov (!%p656_p5), 0   ;;  %v510_v36 = vlaneseq (!%p656_p5)  ;;  %vm516_vm6 = vcmask (!%p656_p5), 27648  }
  0x18   : > { %649 = vmatprep.subr.msk.mxu0 %vm255_vm1, %v249_v2  ;;  %652 = vmatprep.subr.msk.mxu1 %vm255_vm1, %v250_v6  ;;  %v427_v26 = vld [vmem:[%s426_s9] sm:$0xf]  ;;  %vm592_vm7 = vcmask (!%p656_p5), 0  }
  0x19   : > { %650 = vmatpush1.msk.msra.mxu0 %vm255_vm1, %v245_v1  ;;  %653 = vmatpush1.msk.msra.mxu1 %vm255_vm1, %v246_v4  ;;  %v436_v31 = vld [vmem:[%s832_s3] sm:$0xff] (!%p656_p5)  ;;  %v511_v37 = vshrl.u32 (!%p656_p5), %v510_v36, 7  ;;  %v513_v38 = vand.u32 (!%p656_p5), 127, %v510_v36 }
  0x1a   : > { %651 = vmatmul.mubr.msk.f32.vlgmr.msra.gmra.mrb[0].mxu0 %vm251_vm2, %v244_v5  ;;  %654 = vmatmul.mubr.msk.f32.vlgmr.msra.gmra.mrb[0].mxu1 %vm251_vm2, %v244_v5  ;;  %v438_v33 = vcombine.high (!%p656_p5), %v436_v31, %v436_v31  ;;  %v551_v35 = vld [vmem:[%s833_s4] sm:$0xf] (!%p656_p5) }
  0x1b   : > { %685 = vset.pattern.permute.xlu0 (!%p656_p5), %v729_v34  ;;  %vm514_vm5 = vcmp.eq.s32.totalorder (!%p656_p5), %v511_v37, %v513_v38 }
  0x1c   : > { %440 = vmatprep.subr.mxu0 (!%p656_p5), %v438_v33  ;;  %504 = vmatprep.mubr.f32.mxu0 (!%p656_p5), %v438_v33 }
  0x20   : > { %441 = vmatpush1.xpose.msra.mxu0 (!%p656_p5), %v436_v31 }
  0xed   : > { %v330_v7 = vpop.f32.mrb[0].mxu0  ;;  %v401_v10 = vpop.f32.mrb[0].mxu1 }
  0xee   : > { %v406_v8 = vsub.f32 0.0, %v330_v7  ;;  %v332_v9 = vpop.f32.mrb[1].mxu0  ;;  %v408_v12 = vsub.f32 0.0, %v401_v10  ;;  %v403_v13 = vpop.f32.mrb[1].mxu1  ;;  %505 = vmatmul.mubr.f32.vlgmr.msra.gmra.mrb[0].mxu0 (!%p656_p5), %v436_v31 }
  0xef   : > { %v407_v11 = vsub.f32 0.0, %v332_v9  ;;  %v409_v15 = vsub.f32 0.0, %v403_v13 }
  0xf0   : > { %v410_v14 = vmax.f32 %v406_v8, 0.0  ;;  %v412_v17 = vmax.f32 %v408_v12, 0.0 }
  0xf1   : > { %v411_v16 = vmax.f32 %v407_v11, 0.0  ;;  %v413_v20 = vmax.f32 %v409_v15, 0.0 }
  0xf2   : > { %v415_v18 = vsel %vm414_vm3, %v410_v14, 0.0  ;;  %v418_v21 = vsel %vm414_vm3, %v412_v17, 0.0 }
  0xf3   : > { %v416_v19 = vsel %vm414_vm3, %v411_v16, 0.0  ;;  %v420_v24 = vsel %vm414_vm3, %v413_v20, 0.0 }
  0xf4   : > { %v417_v22 = vadd.f32 %v416_v19, %v415_v18 }
  0xf6   : > { %v419_v23 = vadd.f32 %v418_v21, %v417_v22 }
  0xf8   : > { %v421_v25 = vadd.f32 %v420_v24, %v419_v23 }
  0xfa   : > { %422 = vadd.xlane.f32.xlu0 %v421_v25 }
 0x186   : > { %435 = sbr.rel (%p656_p5) target bundleno = 825 (0x339), region = 52 }
 0x187   : > { %v423_v27 = vpop.xlane.xlu0 %422 }
 0x188   : > { %v428_v29 = vmul.f32 %v427_v26, %v423_v27  ;;  %v578_v27 = vld [vmem:[%s834_s5] sm:$0xf] (!%p656_p5) }
 0x18a   : > { %v429_v30 = vadd.f32 %v428_v29, %v424_v28 }
 0x18c   : > { %431 = vst.msk [vmem:[#allocation2] sm:$0xf] %vm430_vm4, %v429_v30 }
 0x193   : > { %v531_v32 = vld [vmem:[#allocation2] sm:$0xf] }
 0x194   : > { %534 = vperm.xlu0 %685, %v531_v32  }
 0x198   : > { %554 = vperm.xlu0 %685, %v551_v35  }
 0x1c1   : > { %v506_v39 = vpop.f32.mrb[0].mxu0 }
 0x1c2   : > { %v515_v40 = vsel %vm514_vm5, %v506_v39, 0.0  ;;  %v508_v41 = vpop.f32.mrb[1].mxu0  ;;  %v527_v8 = vmul.f32 2.0, %v506_v39 }
 0x1c3   : > { %v517_v42 = vsel %vm516_vm6, %v515_v40, 0.0 }
 0x1c4   : > { %518 = vadd.xlane.f32.xlu1 %v517_v42  ;;  %v520_v55 = vrot.slane %v517_v42, 4 }
 0x1c6   : > { %v521_v58 = vadd.f32 %v520_v55, %v517_v42 }
 0x1c8   : > { %v522_v61 = vrot.slane %v521_v58, 2 }
 0x1ca   : > { %v523_v1 = vadd.f32 %v522_v61, %v521_v58 }
 0x1cc   : > { %v524_v4 = vrot.slane %v523_v1, 1 }
 0x1ce   : > { %v525_v6 = vadd.f32 %v524_v4, %v523_v1 }
 0x213   : > { %v535_v43 = vpop.permute.xlu0 %534 }
 0x214   : > { %v537_v44 = vsel %vm514_vm5, %v535_v43, 0.0 }
 0x215   : > { %v538_v45 = vsel %vm516_vm6, %v537_v44, 0.0 }
 0x216   : > { %v539_v46 = vrot.slane %v538_v45, 4 }
 0x217   : > { %v555_v50 = vpop.permute.xlu0 %554 }
 0x218   : > { %v540_v47 = vadd.f32 %v539_v46, %v538_v45  ;;  %v557_v51 = vsel %vm514_vm5, %v555_v50, 0.0 }
 0x219   : > { %v558_v53 = vsel %vm516_vm6, %v557_v51, 0.0 }
 0x21a   : > { %v541_v48 = vrot.slane %v540_v47, 2  ;;  %v559_v56 = vrot.slane %v558_v53, 4 }
 0x21c   : > { %v542_v49 = vadd.f32 %v541_v48, %v540_v47  ;;  %v560_v59 = vadd.f32 %v559_v56, %v558_v53 }
 0x21e   : > { %v543_v52 = vrot.slane %v542_v49, 1  ;;  %v561_v62 = vrot.slane %v560_v59, 2 }
 0x220   : > { %v544_v54 = vadd.f32 %v543_v52, %v542_v49  ;;  %v562_v0 = vadd.f32 %v561_v62, %v560_v59 }
 0x222   : > { %v545_v57 = vsub.f32 %v535_v43, %v544_v54  ;;  %v563_v3 = vrot.slane %v562_v0, 1 }
 0x224   : > { %v546_v60 = vand.u32 2147483647, %v545_v57  ;;  %v564_v5 = vadd.f32 %v563_v3, %v562_v0 }
 0x226   : > { %v547_v63 = vmul.f32 10.0, %v546_v60  ;;  %v565_v10 = vsub.f32 %v555_v50, %v564_v5 }
 0x228   : > { %v548_v2 = vadd.f32 1.0, %v547_v63  ;;  %v566_v13 = vand.u32 2147483647, %v565_v10 }
 0x22a   : > { %687 = vrcp.f32 %v548_v2  ;;  %v567_v17 = vsub.f32 1.0, %v566_v13 }
 0x234   : > { %v688_v15 = vpop.eup %687 }
 0x235   : > { %v550_v19 = vsub.f32 1.0, %v688_v15 }
 0x251   : > { %v519_v7 = vpop.xlane.xlu1 %518 }
 0x252   : > { %v526_v9 = vadd.f32 %v525_v6, %v519_v7 }
 0x254   : > { %v528_v11 = vsub.f32 %v526_v9, %v527_v8 }
 0x256   : > { %v529_v12 = vmul.f32 0.00390625, %v528_v11 }
 0x258   : > { %v530_v14 = vmax.f32 %v529_v12, 0.0 }
 0x25a   : > { %v657_v16 = vadd.f32 -0.1, %v530_v14  ;;  %v573_v20 = vmul.f32 %v567_v17, %v530_v14  ;;  %v570_v23 = vmul.f32 %v688_v15, %v530_v14 }
 0x25c   : > { %v569_v18 = vmax.f32 %v657_v16, 0.0 }
 0x25e   : > { %v571_v21 = vmul.f32 %v569_v18, %v550_v19  ;;  %v574_v22 = vmul.f32 %v569_v18, %v566_v13 }
 0x260   : > { %v575_v24 = vsub.f32 %v573_v20, %v574_v22  ;;  %v572_v25 = vsub.f32 %v570_v23, %v571_v21 }
 0x262   : > { %v576_v26 = vmul.f32 0.1, %v575_v24 }
 0x264   : > { %v577_v28 = vadd.f32 %v576_v26, %v572_v25 }
 0x266   : > { %v579_v29 = vmul.f32 %v578_v27, %v577_v28 }
 0x268   : > { %v580_v30 = vsel %vm516_vm6, %v579_v29, 0.0 }
 0x269   : > { %581 = vadd.xlane.f32.xlu1 %v580_v30 }
 0x2f6   : > { %v582_v31 = vpop.xlane.xlu1 %581 }
 0x2f7   : > { %v583_v32 = vrot.slane %v582_v31, 4 }
 0x2f9   : > { %v584_v33 = vadd.f32 %v583_v32, %v582_v31 }
 0x2fb   : > { %v585_v34 = vrot.slane %v584_v33, 2 }
 0x2fd   : > { %v586_v35 = vadd.f32 %v585_v34, %v584_v33 }
 0x2ff   : > { %v587_v36 = vrot.slane %v586_v35, 1 }
 0x301   : > { %v588_v37 = vadd.f32 %v587_v36, %v586_v35 }
 0x303   : > { %663 = vpush %v588_v37 }
 0x334   : > { %s664_s16 = spop %663 }
 0x335   : > { %v590_v38 = vstv %s664_s16 }
 0x336   : > { %v591_v39 = vmul.f32 0.5, %v590_v38 }
 0x338   : > { %593 = vst.msk [vmem:[#allocation3] sm:$0x1] %vm592_vm7, %v591_v39 }
 0x339 PF: > { %p669_p6 = scmp.eq.s32.totalorder %s772_s22, 1  ;;  %s730_s17 = smov [#allocation3]  }
 0x33a   : > { %s601_s18 = sshll.u32 %s730_s17, 4  ;;  %s602_s18 = int_to_ptr.vmem [resolvable:$true] %s601_s18 }
 0x33b   : > { %s689_s19 = scalar_lea.vmem %s602_s18, 16  ;;  %s695_s20 = scalar_lea.vmem %s602_s18, 32 }
 0x33c   : > { %p690_p7 = scmp.ne.s32.totalorder %s602_s18, %s689_s19  ;;  %p696_p10 = scmp.lt.s32.totalorder %s602_s18, %s602_s18 }
 0x33d   : > { %p697_p11 = scmp.lt.s32.totalorder %s695_s20, %s689_s19 }
 0x33e   : > { %p691_p8 = pnand %p690_p7, %p669_p6 }
 0x33f   : > { %p698_p12 = por %p697_p11, %p696_p10 }
 0x340   : > { %p692_p9 = pneg %p691_p8 }
 0x342   : > { %p699_p13 = pnand %p698_p12, %p692_p9 }
 0x344   : > { %702 = shalt.err (!%p699_p13)
}
 0x345   : > { %s703_s25 = scalar_lea.hbm %s835_s6, 16 }
 0x346   : > { %p704_p0 = scmp.ne.s32.totalorder %s835_s6, %s703_s25  ;;  %p709_p3 = scmp.lt.u32.totalorder %s703_s25, %s835_s6 }
 0x348   : > { %p705_p1 = pnand %p704_p0, %p669_p6 }
 0x34a   : > { %p706_p2 = pneg %p705_p1 }
 0x34c   : > { %p711_p4 = pnand %p709_p3, %p706_p2 }
 0x34e   : > { %714 = shalt.err (!%p711_p4)
}
 0x34f   : > { %666 = dma.vmem_to_hbm [thread:$0]  (%p669_p6), %s602_s18, 16, %s835_s6, [#allocation4]  }
 0x350   : > { %720 = dma.done.wait (%p669_p6), [#allocation4], 16  }
 0x351   : > { %722 = vsyncadd (%p669_p6), [#allocation4], 4294967280 }
 0x352 PF: > { %s17_s21 = sadd.s32 1, %s725_s21  }
 0x353   : > { %p14_p5 = scmp.ge.s32.totalorder %s17_s21, 4  }
 0x355   :  { %16 = sbr.rel (!%p14_p5) target bundleno = 1 (0x1), region = 80 }
 0x35c   :  { %614 = vsyncpa [#allocation4], 1 }
 0x35d   :  { %616 = vsyncpa [#allocation4 + $0x1], 1 }

</bundles_post_ra>
